<compile_context>
chip_gen: v7x
topology: tpu7x:2x2x1
jax: 0.10.0
libtpu: 0.0.40
codegen_flags: <defaults>
</compile_context>

<pallas_src>
import functools

import numpy as np
import jax
import jax.numpy as jnp
from jax.experimental import pallas as pl
from jax.experimental.pallas import tpu as pltpu

NUM_HEADS = 2   # fixed by the torch module
LANE = 128


def _ru(x, m):
    return ((x + m - 1) // m) * m


# ---------------------------------------------------------------------------
# Slab layouts (shared by the packer and the kernel so offsets cannot drift).
# ---------------------------------------------------------------------------
def _wslab_layout(robot_size, human_size, attn_size, num_heads):
    A = attn_size
    qa = num_heads * A
    kva = num_heads * 2 * A
    width = _ru(kva, LANE)
    off, r = {}, 0
    for name, rows in (("w1q", robot_size), ("w2q", qa),
                       ("w1kv", human_size), ("w2kv", kva), ("wf", qa)):
        off[name] = r
        r += _ru(rows, 16)          # bf16 sublane tile = 16 rows
    return off, r, width


def _vslab_layout(attn_size, num_heads):
    kva = num_heads * 2 * attn_size
    width = _ru(kva, LANE)
    off, r = {}, 0
    for name, rows in (("vq", 6), ("vkv", 6), ("bfin", 1)):
        off[name] = r
        r += _ru(rows, 8)           # f32 sublane tile = 8 rows
    return off, r, width


def _cslab_layout(batch, n_humans, attn_size, num_heads):
    A = attn_size
    qa = num_heads * A
    kva = num_heads * 2 * A
    BN = batch * n_humans
    width = _ru(max(kva, BN), LANE)
    off, r = {}, 0
    for name, rows in (("Mkv", kva), ("Mq", qa), ("E", BN),
                       ("J", batch), ("OFF", batch)):
        off[name] = r
        r += _ru(rows, 8)
    return off, r, width


def _seg_avg_np(width, seg):
    blk = np.arange(width) // seg
    return (blk[:, None] == blk[None, :]).astype(np.float32) / float(seg)


@functools.lru_cache(maxsize=None)
def _make_const_slab(batch, n_humans, attn_size, num_heads):
    A = attn_size
    qa = num_heads * A
    kva = num_heads * 2 * A
    N = n_humans
    BN = batch * N
    off, rows, width = _cslab_layout(batch, N, A, num_heads)
    c = np.zeros((rows, width), np.float32)
    # Block-diagonal per-segment averaging matrices (segmented LayerNorm).
    c[off["Mkv"]:off["Mkv"] + kva, :kva] = _seg_avg_np(kva, A)
    c[off["Mq"]:off["Mq"] + qa, :qa] = _seg_avg_np(qa, A)
    # E: vertical stack of B (N x N) identities; p @ E extracts the per-batch
    # diagonal attention block (off-block probabilities are exactly zero).
    c[off["E"]:off["E"] + BN, :N] = np.tile(np.eye(N, dtype=np.float32), (batch, 1))
    col = np.arange(BN)
    own = (col // N)[None, :] == np.arange(batch)[:, None]          # (B, BN)
    col_j = (col % N).astype(np.float32)
    # J: within-block human index, sentinel (>= any det) off-block.
    c[off["J"]:off["J"] + batch, :BN] = np.where(own, col_j[None, :], 1e9)
    # OFF: extra -1e9 for off-block columns (total <= -2e9 -> exp underflows to
    # exactly 0, so per-head row sums and the diagonal extraction reproduce the
    # per-batch softmax of the torch module, including detected_humans == 0).
    c[off["OFF"]:off["OFF"] + batch, :BN] = np.where(own, 0.0, -1e9)
    return jnp.asarray(c)


# ---------------------------------------------------------------------------
# Kernel (built per static shape; all offsets / sizes are Python ints).
# ---------------------------------------------------------------------------
def _build_kernel(batch, n_humans, robot_size, human_size, attn_size, num_heads):
    A = attn_size
    qa = num_heads * A
    kva = num_heads * 2 * A
    B, N = batch, n_humans
    BN = B * N
    temperature = 1.0 / float(np.sqrt(A))

    w_off, _, _ = _wslab_layout(robot_size, human_size, A, num_heads)
    v_off, _, _ = _vslab_layout(A, num_heads)
    c_off, _, _ = _cslab_layout(B, N, A, num_heads)

    f32 = jnp.float32
    bf16 = jnp.bfloat16

    def kernel(robot_ref, hh_ref, det_ref, w_ref, v_ref, c_ref, out_ref):
        # ---- precomputed constants (one slab, static sub-views) ----
        Mkv = c_ref[c_off["Mkv"]:c_off["Mkv"] + kva, :kva]
        Mq = c_ref[c_off["Mq"]:c_off["Mq"] + qa, :qa]
        E = c_ref[c_off["E"]:c_off["E"] + BN, :N]
        J = c_ref[c_off["J"]:c_off["J"] + B, :BN]
        OFF = c_ref[c_off["OFF"]:c_off["OFF"] + B, :BN]

        # ---- packed parameters ----
        w1q = w_ref[w_off["w1q"]:w_off["w1q"] + robot_size, :qa]
        w2q = w_ref[w_off["w2q"]:w_off["w2q"] + qa, :qa]
        w1kv = w_ref[w_off["w1kv"]:w_off["w1kv"] + human_size, :kva]
        w2kv = w_ref[w_off["w2kv"]:w_off["w2kv"] + kva, :kva]
        vq = v_ref[v_off["vq"]:v_off["vq"] + 6, :qa]
        vkv = v_ref[v_off["vkv"]:v_off["vkv"] + 6, :kva]
        bfin = v_ref[v_off["bfin"]:v_off["bfin"] + 1, :A]

        def seg_ln(x, gamma, beta, M, eps=1e-5):
            # x @ M broadcasts each A-wide segment mean across its lanes, so the
            # segmented LayerNorm needs no reshapes / narrow reductions.
            mu = jnp.dot(x, M, preferred_element_type=f32)
            xc = x - mu
            var = jnp.dot(xc * xc, M, preferred_element_type=f32)
            return xc * jax.lax.rsqrt(var + eps) * gamma + beta

        def fused_mlp(x, w1, w2, vecs, M):
            # Linear -> LN -> ReLU -> Linear -> LN, fused over all segments
            # (heads / K|V projections) packed along the lane axis.
            b1, g1, be1 = vecs[0:1, :], vecs[1:2, :], vecs[2:3, :]
            b2, g2, be2 = vecs[3:4, :], vecs[4:5, :], vecs[5:6, :]
            h = jnp.dot(x, w1, preferred_element_type=f32) + b1
            h = seg_ln(h, g1, be1, M)
            h = jnp.maximum(h, 0.0)
            h = jnp.dot(h.astype(bf16), w2, preferred_element_type=f32) + b2
            return seg_ln(h, g2, be2, M)

        Q = fused_mlp(robot_ref[...], w1q, w2q, vq, Mq)      # (B, 2A)  [Q0|Q1]
        KV = fused_mlp(hh_ref[...], w1kv, w2kv, vkv, Mkv)    # (BN, 4A) [K0|V0|K1|V1]

        det = det_ref[...]                                   # (B, 1) f32
        valid = J < det                                      # (B, BN)

        Qb = Q.astype(bf16)
        KVb = KV.astype(bf16)

        out_ref[...] = jnp.zeros_like(out_ref)               # zero lane padding

        out_val = None
        for h in range(num_heads):
            qh = Qb[:, h * A:(h + 1) * A]                    # (B, A)
            kh = KVb[:, h * 2 * A: h * 2 * A + A]            # (BN, A)
            vh = KVb[:, h * 2 * A + A: (h + 1) * 2 * A]      # (BN, A)

            s = jax.lax.dot_general(qh, kh, (((1,), (1,)), ((), ())),
                                    preferred_element_type=f32) * temperature
            # replace (matches torch masked_fill) + push off-block columns a
            # further -1e9 down so their exp is exactly 0.
            s = jnp.where(valid, s, f32(-1e9)) + OFF
            m = jnp.max(s, axis=-1, keepdims=True)
            e = jnp.exp(s - m)
            denom = jnp.sum(e, axis=-1, keepdims=True)
            p = e * pl.reciprocal(denom, approx=True)        # (B, BN) f32 softmax

            wv = jnp.dot(p.astype(bf16), vh, preferred_element_type=f32)   # (B, A)
            wf_h = w_ref[w_off["wf"] + h * A: w_off["wf"] + (h + 1) * A, :A]
            contrib = jnp.dot(wv.astype(bf16), wf_h, preferred_element_type=f32)
            out_val = contrib if out_val is None else out_val + contrib

            # per-batch diagonal of the attention matrix, straight to lanes.
            out_ref[:, A + h * N: A + (h + 1) * N] = jnp.dot(
                p, E, preferred_element_type=f32)

        out_ref[:, 0:A] = out_val + bfin

    return kernel


# ---------------------------------------------------------------------------
# Parameter construction (mirrors torch init_: orthogonal weights gain sqrt(2),
# zero biases, LayerNorm gamma=1 / beta=0), packed once into two slabs.
# ---------------------------------------------------------------------------
def _orthogonal(key, out_f, in_f, gain):
    rows, cols = out_f, in_f
    a = jax.random.normal(key, (rows, cols), dtype=jnp.float32)
    transposed = rows < cols
    if transposed:
        a = a.T
    q, r = jnp.linalg.qr(a)
    q = q * jnp.sign(jnp.diagonal(r))
    if transposed:
        q = q.T
    # torch weight is (out, in); we store (in, out) for x @ W
    return np.asarray((gain * q).T, dtype=np.float32)


def make_params(key, robot_size, human_size, attn_size, num_heads=NUM_HEADS):
    gain = float(np.sqrt(2.0))
    A = attn_size
    keys = jax.random.split(key, num_heads * 3 + 1)

    def mlp_raw(k, in_size):
        k1, k2 = jax.random.split(k)
        return dict(
            w1=_orthogonal(k1, A, in_size, gain),
            b1=np.zeros((A,), np.float32), g1=np.ones((A,), np.float32),
            be1=np.zeros((A,), np.float32),
            w2=_orthogonal(k2, A, A, gain),
            b2=np.zeros((A,), np.float32), g2=np.ones((A,), np.float32),
            be2=np.zeros((A,), np.float32),
        )

    q_raw = [mlp_raw(keys[3 * h + 0], robot_size) for h in range(num_heads)]
    k_raw = [mlp_raw(keys[3 * h + 1], human_size) for h in range(num_heads)]
    v_raw = [mlp_raw(keys[3 * h + 2], human_size) for h in range(num_heads)]

    # lane orders: query slab [Q0|Q1]; key/value slab [K0|V0|K1|V1]
    kv_segments = []
    for h in range(num_heads):
        kv_segments += [k_raw[h], v_raw[h]]

    def fused_w1(segs):
        return np.concatenate([s["w1"] for s in segs], axis=1)

    def block_diag_w2(segs):
        n = sum(s["w2"].shape[0] for s in segs)
        m = sum(s["w2"].shape[1] for s in segs)
        out = np.zeros((n, m), np.float32)
        r = c = 0
        for s in segs:
            w = s["w2"]
            out[r:r + w.shape[0], c:c + w.shape[1]] = w
            r += w.shape[0]
            c += w.shape[1]
        return out

    def fused_vecs(segs):
        return np.stack(
            [np.concatenate([s[name] for s in segs], axis=0)
             for name in ("b1", "g1", "be1", "b2", "g2", "be2")], axis=0)

    wf = _orthogonal(keys[-1], A, num_heads * A, gain)          # (2A, A)

    w_off, w_rows, w_width = _wslab_layout(robot_size, human_size, A, num_heads)
    wslab = np.zeros((w_rows, w_width), np.float32)

    def put(name, arr):
        r0 = w_off[name]
        wslab[r0:r0 + arr.shape[0], :arr.shape[1]] = arr

    put("w1q", fused_w1(q_raw))
    put("w2q", block_diag_w2(q_raw))
    put("w1kv", fused_w1(kv_segments))
    put("w2kv", block_diag_w2(kv_segments))
    put("wf", wf)

    v_off, v_rows, v_width = _vslab_layout(A, num_heads)
    vslab = np.zeros((v_rows, v_width), np.float32)
    vq = fused_vecs(q_raw)                                      # (6, 2A)
    vkv = fused_vecs(kv_segments)                               # (6, 4A)
    vslab[v_off["vq"]:v_off["vq"] + 6, :vq.shape[1]] = vq
    vslab[v_off["vkv"]:v_off["vkv"] + 6, :vkv.shape[1]] = vkv
    # bfin row (final-linear bias) stays zero.

    return (jnp.asarray(wslab, dtype=jnp.bfloat16),
            jnp.asarray(vslab, dtype=jnp.float32))


# ---------------------------------------------------------------------------
# Wrapper
# ---------------------------------------------------------------------------
@functools.partial(jax.jit, static_argnames=("attn_size", "num_heads"))
def robot_human_attention(robot_embedding, HH_embedding, detected_humans,
                          wslab, vslab, *, attn_size, num_heads=NUM_HEADS):
    B, N, H = HH_embedding.shape
    R = robot_embedding.shape[1]
    A = attn_size

    robot = robot_embedding.astype(jnp.bfloat16)
    hh_flat = HH_embedding.reshape(B * N, H).astype(jnp.bfloat16)
    det = detected_humans.astype(jnp.float32).reshape(B, 1)

    cslab = _make_const_slab(B, N, A, num_heads)   # compile-time constant
    kernel = _build_kernel(B, N, R, H, A, num_heads)

    out_w = _ru(A + num_heads * N, LANE)           # single lane-dense output slab
    vmem = pltpu.MemorySpace.VMEM
    slab = pl.pallas_call(
        kernel,
        out_shape=jax.ShapeDtypeStruct((B, out_w), jnp.float32),
        in_specs=[pl.BlockSpec(memory_space=vmem)] * 6,
        out_specs=pl.BlockSpec(memory_space=vmem),
    )(robot, hh_flat, det, wslab, vslab, cslab)

    out = slab[:, :A]
    attn_list = [slab[:, A + h * N: A + (h + 1) * N].reshape(B, N, 1)
                 for h in range(num_heads)]
    return out, attn_list


# ---------------------------------------------------------------------------
# Demo
# ---------------------------------------------------------------------------
if __name__ == "__main__":
    B = 2              # batch
    N = 8              # max_human_num
    ROBOT_SIZE = 32    # robot_embedding_size
    HUMAN_SIZE = 32    # HHAttn_attn_size
    ATTN_SIZE = 32     # final_attention_size

    root = jax.random.PRNGKey(0)
    k_params, k_robot, k_hh, k_det = jax.random.split(root, 4)

    wslab, vslab = make_params(k_params, ROBOT_SIZE, HUMAN_SIZE, ATTN_SIZE)

    robot_embedding = jax.random.normal(k_robot, (B, ROBOT_SIZE), dtype=jnp.float32)
    HH_embedding = jax.random.normal(k_hh, (B, N, HUMAN_SIZE), dtype=jnp.float32)
    detected_humans = jax.random.randint(k_det, (B,), 1, N + 1, dtype=jnp.int32)

    out, attn_list = robot_human_attention(
        robot_embedding, HH_embedding, detected_humans, wslab, vslab,
        attn_size=ATTN_SIZE)
    jax.block_until_ready(out)
    jax.block_until_ready(attn_list)

    assert out.shape == (B, ATTN_SIZE)
    assert len(attn_list) == NUM_HEADS and attn_list[0].shape == (B, N, 1)
    # sanity: each attention row is a valid distribution and the output is finite
    for a in attn_list:
        assert bool(jnp.all(jnp.abs(a.sum(axis=1) - 1.0) < 1e-2))
    assert bool(jnp.all(jnp.isfinite(out)))
    print("KERNEL_OK")
</pallas_src>

<mosaic_0001>
module attributes {stable_mosaic.version = 11 : i64} {
  func.func @kernel(%arg0: memref<2x32xbf16, #tpu.memory_space<vmem>>, %arg1: memref<16x32xbf16, #tpu.memory_space<vmem>>, %arg2: memref<2x1xf32, #tpu.memory_space<vmem>>, %arg3: memref<320x128xbf16, #tpu.memory_space<vmem>>, %arg4: memref<24x128xf32, #tpu.memory_space<vmem>>, %arg5: memref<224x128xf32, #tpu.memory_space<vmem>>, %arg6: memref<2x128xf32, #tpu.memory_space<vmem>>) attributes {dimension_semantics = [], scalar_prefetch = 0 : i64, scratch_operands = 0 : i64, tpu.core_type = #tpu.core_type<tc>} {
    %c0 = arith.constant 0 : index
    %c0_0 = arith.constant 0 : index
    %0 = vector.load %arg5[%c0, %c0_0] : memref<224x128xf32, #tpu.memory_space<vmem>>, vector<128x128xf32>
    %c128 = arith.constant 128 : index
    %c0_1 = arith.constant 0 : index
    %1 = vector.load %arg5[%c128, %c0_1] : memref<224x128xf32, #tpu.memory_space<vmem>>, vector<64x64xf32>
    %c192 = arith.constant 192 : index
    %c0_2 = arith.constant 0 : index
    %2 = vector.load %arg5[%c192, %c0_2] : memref<224x128xf32, #tpu.memory_space<vmem>>, vector<16x8xf32>
    %c208 = arith.constant 208 : index
    %c0_3 = arith.constant 0 : index
    %3 = vector.load %arg5[%c208, %c0_3] : memref<224x128xf32, #tpu.memory_space<vmem>>, vector<2x16xf32>
    %c216 = arith.constant 216 : index
    %c0_4 = arith.constant 0 : index
    %4 = vector.load %arg5[%c216, %c0_4] : memref<224x128xf32, #tpu.memory_space<vmem>>, vector<2x16xf32>
    %c0_5 = arith.constant 0 : index
    %c0_6 = arith.constant 0 : index
    %5 = vector.load %arg3[%c0_5, %c0_6] : memref<320x128xbf16, #tpu.memory_space<vmem>>, vector<32x64xbf16>
    %c32 = arith.constant 32 : index
    %c0_7 = arith.constant 0 : index
    %6 = vector.load %arg3[%c32, %c0_7] : memref<320x128xbf16, #tpu.memory_space<vmem>>, vector<64x64xbf16>
    %c96 = arith.constant 96 : index
    %c0_8 = arith.constant 0 : index
    %7 = vector.load %arg3[%c96, %c0_8] : memref<320x128xbf16, #tpu.memory_space<vmem>>, vector<32x128xbf16>
    %c128_9 = arith.constant 128 : index
    %c0_10 = arith.constant 0 : index
    %8 = vector.load %arg3[%c128_9, %c0_10] : memref<320x128xbf16, #tpu.memory_space<vmem>>, vector<128x128xbf16>
    %c0_11 = arith.constant 0 : index
    %c0_12 = arith.constant 0 : index
    %9 = vector.load %arg4[%c0_11, %c0_12] : memref<24x128xf32, #tpu.memory_space<vmem>>, vector<6x64xf32>
    %c8 = arith.constant 8 : index
    %c0_13 = arith.constant 0 : index
    %10 = vector.load %arg4[%c8, %c0_13] : memref<24x128xf32, #tpu.memory_space<vmem>>, vector<6x128xf32>
    %c16 = arith.constant 16 : index
    %c0_14 = arith.constant 0 : index
    %11 = vector.load %arg4[%c16, %c0_14] : memref<24x128xf32, #tpu.memory_space<vmem>>, vector<1x32xf32>
    %c0_15 = arith.constant 0 : index
    %c0_16 = arith.constant 0 : index
    %12 = vector.load %arg0[%c0_15, %c0_16] : memref<2x32xbf16, #tpu.memory_space<vmem>>, vector<2x32xbf16>
    %13 = vector.extract_strided_slice %9 {offsets = [0, 0], sizes = [1, 64], strides = [1, 1]} : vector<6x64xf32> to vector<1x64xf32>
    %14 = vector.extract_strided_slice %9 {offsets = [1, 0], sizes = [1, 64], strides = [1, 1]} : vector<6x64xf32> to vector<1x64xf32>
    %15 = vector.extract_strided_slice %9 {offsets = [2, 0], sizes = [1, 64], strides = [1, 1]} : vector<6x64xf32> to vector<1x64xf32>
    %16 = vector.extract_strided_slice %9 {offsets = [3, 0], sizes = [1, 64], strides = [1, 1]} : vector<6x64xf32> to vector<1x64xf32>
    %17 = vector.extract_strided_slice %9 {offsets = [4, 0], sizes = [1, 64], strides = [1, 1]} : vector<6x64xf32> to vector<1x64xf32>
    %18 = vector.extract_strided_slice %9 {offsets = [5, 0], sizes = [1, 64], strides = [1, 1]} : vector<6x64xf32> to vector<1x64xf32>
    %cst = arith.constant dense<0.000000e+00> : vector<2x64xf32>
    %19 = tpu.matmul %12, %5, %cst {dimension_numbers = #tpu.dot_dimension_numbers<[1], [0], [0], [1], [0, 0, 1, 1], [], []>} : vector<2x32xbf16>, vector<32x64xbf16>, vector<2x64xf32> -> vector<2x64xf32>
    %20 = vector.broadcast %13 : vector<1x64xf32> to vector<2x64xf32>
    %21 = arith.addf %19, %20 : vector<2x64xf32>
    %cst_17 = arith.constant dense<0.000000e+00> : vector<2x64xf32>
    %22 = tpu.matmul %21, %1, %cst_17 {dimension_numbers = #tpu.dot_dimension_numbers<[1], [0], [0], [1], [0, 0, 1, 1], [], []>} : vector<2x64xf32>, vector<64x64xf32>, vector<2x64xf32> -> vector<2x64xf32>
    %23 = arith.subf %21, %22 : vector<2x64xf32>
    %24 = arith.mulf %23, %23 : vector<2x64xf32>
    %cst_18 = arith.constant dense<0.000000e+00> : vector<2x64xf32>
    %25 = tpu.matmul %24, %1, %cst_18 {dimension_numbers = #tpu.dot_dimension_numbers<[1], [0], [0], [1], [0, 0, 1, 1], [], []>} : vector<2x64xf32>, vector<64x64xf32>, vector<2x64xf32> -> vector<2x64xf32>
    %cst_19 = arith.constant 9.99999974E-6 : f32
    %26 = vector.broadcast %cst_19 : f32 to vector<2x64xf32>
    %27 = arith.addf %25, %26 : vector<2x64xf32>
    %28 = math.rsqrt %27 : vector<2x64xf32>
    %29 = arith.mulf %23, %28 : vector<2x64xf32>
    %30 = vector.broadcast %14 : vector<1x64xf32> to vector<2x64xf32>
    %31 = arith.mulf %29, %30 : vector<2x64xf32>
    %32 = vector.broadcast %15 : vector<1x64xf32> to vector<2x64xf32>
    %33 = arith.addf %31, %32 : vector<2x64xf32>
    %cst_20 = arith.constant 0.000000e+00 : f32
    %34 = vector.broadcast %cst_20 : f32 to vector<2x64xf32>
    %35 = arith.maximumf %33, %34 : vector<2x64xf32>
    %36 = arith.truncf %35 : vector<2x64xf32> to vector<2x64xbf16>
    %cst_21 = arith.constant dense<0.000000e+00> : vector<2x64xf32>
    %37 = tpu.matmul %36, %6, %cst_21 {dimension_numbers = #tpu.dot_dimension_numbers<[1], [0], [0], [1], [0, 0, 1, 1], [], []>} : vector<2x64xbf16>, vector<64x64xbf16>, vector<2x64xf32> -> vector<2x64xf32>
    %38 = vector.broadcast %16 : vector<1x64xf32> to vector<2x64xf32>
    %39 = arith.addf %37, %38 : vector<2x64xf32>
    %cst_22 = arith.constant dense<0.000000e+00> : vector<2x64xf32>
    %40 = tpu.matmul %39, %1, %cst_22 {dimension_numbers = #tpu.dot_dimension_numbers<[1], [0], [0], [1], [0, 0, 1, 1], [], []>} : vector<2x64xf32>, vector<64x64xf32>, vector<2x64xf32> -> vector<2x64xf32>
    %41 = arith.subf %39, %40 : vector<2x64xf32>
    %42 = arith.mulf %41, %41 : vector<2x64xf32>
    %cst_23 = arith.constant dense<0.000000e+00> : vector<2x64xf32>
    %43 = tpu.matmul %42, %1, %cst_23 {dimension_numbers = #tpu.dot_dimension_numbers<[1], [0], [0], [1], [0, 0, 1, 1], [], []>} : vector<2x64xf32>, vector<64x64xf32>, vector<2x64xf32> -> vector<2x64xf32>
    %cst_24 = arith.constant 9.99999974E-6 : f32
    %44 = vector.broadcast %cst_24 : f32 to vector<2x64xf32>
    %45 = arith.addf %43, %44 : vector<2x64xf32>
    %46 = math.rsqrt %45 : vector<2x64xf32>
    %47 = arith.mulf %41, %46 : vector<2x64xf32>
    %48 = vector.broadcast %17 : vector<1x64xf32> to vector<2x64xf32>
    %49 = arith.mulf %47, %48 : vector<2x64xf32>
    %50 = vector.broadcast %18 : vector<1x64xf32> to vector<2x64xf32>
    %51 = arith.addf %49, %50 : vector<2x64xf32>
    %c0_25 = arith.constant 0 : index
    %c0_26 = arith.constant 0 : index
    %52 = vector.load %arg1[%c0_25, %c0_26] : memref<16x32xbf16, #tpu.memory_space<vmem>>, vector<16x32xbf16>
    %53 = vector.extract_strided_slice %10 {offsets = [0, 0], sizes = [1, 128], strides = [1, 1]} : vector<6x128xf32> to vector<1x128xf32>
    %54 = vector.extract_strided_slice %10 {offsets = [1, 0], sizes = [1, 128], strides = [1, 1]} : vector<6x128xf32> to vector<1x128xf32>
    %55 = vector.extract_strided_slice %10 {offsets = [2, 0], sizes = [1, 128], strides = [1, 1]} : vector<6x128xf32> to vector<1x128xf32>
    %56 = vector.extract_strided_slice %10 {offsets = [3, 0], sizes = [1, 128], strides = [1, 1]} : vector<6x128xf32> to vector<1x128xf32>
    %57 = vector.extract_strided_slice %10 {offsets = [4, 0], sizes = [1, 128], strides = [1, 1]} : vector<6x128xf32> to vector<1x128xf32>
    %58 = vector.extract_strided_slice %10 {offsets = [5, 0], sizes = [1, 128], strides = [1, 1]} : vector<6x128xf32> to vector<1x128xf32>
    %cst_27 = arith.constant dense<0.000000e+00> : vector<16x128xf32>
    %59 = tpu.matmul %52, %7, %cst_27 {dimension_numbers = #tpu.dot_dimension_numbers<[1], [0], [0], [1], [0, 0, 1, 1], [], []>} : vector<16x32xbf16>, vector<32x128xbf16>, vector<16x128xf32> -> vector<16x128xf32>
    %60 = vector.broadcast %53 : vector<1x128xf32> to vector<16x128xf32>
    %61 = arith.addf %59, %60 : vector<16x128xf32>
    %cst_28 = arith.constant dense<0.000000e+00> : vector<16x128xf32>
    %62 = tpu.matmul %61, %0, %cst_28 {dimension_numbers = #tpu.dot_dimension_numbers<[1], [0], [0], [1], [0, 0, 1, 1], [], []>} : vector<16x128xf32>, vector<128x128xf32>, vector<16x128xf32> -> vector<16x128xf32>
    %63 = arith.subf %61, %62 : vector<16x128xf32>
    %64 = arith.mulf %63, %63 : vector<16x128xf32>
    %cst_29 = arith.constant dense<0.000000e+00> : vector<16x128xf32>
    %65 = tpu.matmul %64, %0, %cst_29 {dimension_numbers = #tpu.dot_dimension_numbers<[1], [0], [0], [1], [0, 0, 1, 1], [], []>} : vector<16x128xf32>, vector<128x128xf32>, vector<16x128xf32> -> vector<16x128xf32>
    %cst_30 = arith.constant 9.99999974E-6 : f32
    %66 = vector.broadcast %cst_30 : f32 to vector<16x128xf32>
    %67 = arith.addf %65, %66 : vector<16x128xf32>
    %68 = math.rsqrt %67 : vector<16x128xf32>
    %69 = arith.mulf %63, %68 : vector<16x128xf32>
    %70 = vector.broadcast %54 : vector<1x128xf32> to vector<16x128xf32>
    %71 = arith.mulf %69, %70 : vector<16x128xf32>
    %72 = vector.broadcast %55 : vector<1x128xf32> to vector<16x128xf32>
    %73 = arith.addf %71, %72 : vector<16x128xf32>
    %cst_31 = arith.constant 0.000000e+00 : f32
    %74 = vector.broadcast %cst_31 : f32 to vector<16x128xf32>
    %75 = arith.maximumf %73, %74 : vector<16x128xf32>
    %76 = arith.truncf %75 : vector<16x128xf32> to vector<16x128xbf16>
    %cst_32 = arith.constant dense<0.000000e+00> : vector<16x128xf32>
    %77 = tpu.matmul %76, %8, %cst_32 {dimension_numbers = #tpu.dot_dimension_numbers<[1], [0], [0], [1], [0, 0, 1, 1], [], []>} : vector<16x128xbf16>, vector<128x128xbf16>, vector<16x128xf32> -> vector<16x128xf32>
    %78 = vector.broadcast %56 : vector<1x128xf32> to vector<16x128xf32>
    %79 = arith.addf %77, %78 : vector<16x128xf32>
    %cst_33 = arith.constant dense<0.000000e+00> : vector<16x128xf32>
    %80 = tpu.matmul %79, %0, %cst_33 {dimension_numbers = #tpu.dot_dimension_numbers<[1], [0], [0], [1], [0, 0, 1, 1], [], []>} : vector<16x128xf32>, vector<128x128xf32>, vector<16x128xf32> -> vector<16x128xf32>
    %81 = arith.subf %79, %80 : vector<16x128xf32>
    %82 = arith.mulf %81, %81 : vector<16x128xf32>
    %cst_34 = arith.constant dense<0.000000e+00> : vector<16x128xf32>
    %83 = tpu.matmul %82, %0, %cst_34 {dimension_numbers = #tpu.dot_dimension_numbers<[1], [0], [0], [1], [0, 0, 1, 1], [], []>} : vector<16x128xf32>, vector<128x128xf32>, vector<16x128xf32> -> vector<16x128xf32>
    %cst_35 = arith.constant 9.99999974E-6 : f32
    %84 = vector.broadcast %cst_35 : f32 to vector<16x128xf32>
    %85 = arith.addf %83, %84 : vector<16x128xf32>
    %86 = math.rsqrt %85 : vector<16x128xf32>
    %87 = arith.mulf %81, %86 : vector<16x128xf32>
    %88 = vector.broadcast %57 : vector<1x128xf32> to vector<16x128xf32>
    %89 = arith.mulf %87, %88 : vector<16x128xf32>
    %90 = vector.broadcast %58 : vector<1x128xf32> to vector<16x128xf32>
    %91 = arith.addf %89, %90 : vector<16x128xf32>
    %c0_36 = arith.constant 0 : index
    %c0_37 = arith.constant 0 : index
    %92 = vector.load %arg2[%c0_36, %c0_37] : memref<2x1xf32, #tpu.memory_space<vmem>>, vector<2x1xf32>
    %93 = vector.broadcast %92 : vector<2x1xf32> to vector<2x16xf32>
    %94 = arith.cmpf olt, %3, %93 : vector<2x16xf32>
    %95 = arith.truncf %51 : vector<2x64xf32> to vector<2x64xbf16>
    %96 = arith.truncf %91 : vector<16x128xf32> to vector<16x128xbf16>
    %cst_38 = arith.constant 0.000000e+00 : f32
    %97 = vector.broadcast %cst_38 : f32 to vector<2x128xf32>
    %c0_39 = arith.constant 0 : index
    %c0_40 = arith.constant 0 : index
    %98 = vector.load %arg6[%c0_39, %c0_40] : memref<2x128xf32, #tpu.memory_space<vmem>>, vector<2x128xf32>
    tpu.vector_store %arg6[%c0_39, %c0_40], %97 {strides = array<i32>} : memref<2x128xf32, #tpu.memory_space<vmem>>, vector<2x128xf32>,
    %99 = vector.extract_strided_slice %95 {offsets = [0, 0], sizes = [2, 32], strides = [1, 1]} : vector<2x64xbf16> to vector<2x32xbf16>
    %100 = vector.extract_strided_slice %96 {offsets = [0, 0], sizes = [16, 32], strides = [1, 1]} : vector<16x128xbf16> to vector<16x32xbf16>
    %101 = vector.extract_strided_slice %96 {offsets = [0, 32], sizes = [16, 32], strides = [1, 1]} : vector<16x128xbf16> to vector<16x32xbf16>
    %cst_41 = arith.constant dense<0.000000e+00> : vector<2x16xf32>
    %102 = tpu.matmul %99, %100, %cst_41 {dimension_numbers = #tpu.dot_dimension_numbers<[1], [1], [0], [0], [0, 0, 1, 0], [], []>} : vector<2x32xbf16>, vector<16x32xbf16>, vector<2x16xf32> -> vector<2x16xf32>
    %cst_42 = arith.constant 0.176776692 : f32
    %103 = vector.broadcast %cst_42 : f32 to vector<2x16xf32>
    %104 = arith.mulf %102, %103 : vector<2x16xf32>
    %cst_43 = arith.constant -1.000000e+09 : f32
    %105 = vector.broadcast %cst_43 : f32 to vector<2x16xf32>
    %106 = arith.select %94, %104, %105 : vector<2x16xi1>, vector<2x16xf32>
    %107 = arith.addf %106, %4 : vector<2x16xf32>
    %cst_44 = arith.constant dense<0xFF800000> : vector<2xf32>
    %108 = vector.multi_reduction <maximumf>, %107, %cst_44 [1] : vector<2x16xf32> to vector<2xf32>
    %109 = vector.shape_cast %108 : vector<2xf32> to vector<2x1xf32>
    %110 = vector.broadcast %109 : vector<2x1xf32> to vector<2x16xf32>
    %111 = arith.subf %107, %110 : vector<2x16xf32>
    %112 = math.exp %111 : vector<2x16xf32>
    %cst_45 = arith.constant dense<0.000000e+00> : vector<2xf32>
    %113 = vector.multi_reduction <add>, %112, %cst_45 [1] : vector<2x16xf32> to vector<2xf32>
    %114 = vector.shape_cast %113 : vector<2xf32> to vector<2x1xf32>
    %115 = tpu.reciprocal %114 {approx = true} : vector<2x1xf32> -> vector<2x1xf32>
    %116 = vector.broadcast %115 : vector<2x1xf32> to vector<2x16xf32>
    %117 = arith.mulf %112, %116 : vector<2x16xf32>
    %118 = arith.truncf %117 : vector<2x16xf32> to vector<2x16xbf16>
    %cst_46 = arith.constant dense<0.000000e+00> : vector<2x32xf32>
    %119 = tpu.matmul %118, %101, %cst_46 {dimension_numbers = #tpu.dot_dimension_numbers<[1], [0], [0], [1], [0, 0, 1, 1], [], []>} : vector<2x16xbf16>, vector<16x32xbf16>, vector<2x32xf32> -> vector<2x32xf32>
    %c256 = arith.constant 256 : index
    %c0_47 = arith.constant 0 : index
    %120 = vector.load %arg3[%c256, %c0_47] : memref<320x128xbf16, #tpu.memory_space<vmem>>, vector<32x32xbf16>
    %121 = arith.truncf %119 : vector<2x32xf32> to vector<2x32xbf16>
    %cst_48 = arith.constant dense<0.000000e+00> : vector<2x32xf32>
    %122 = tpu.matmul %121, %120, %cst_48 {dimension_numbers = #tpu.dot_dimension_numbers<[1], [0], [0], [1], [0, 0, 1, 1], [], []>} : vector<2x32xbf16>, vector<32x32xbf16>, vector<2x32xf32> -> vector<2x32xf32>
    %cst_49 = arith.constant dense<0.000000e+00> : vector<2x8xf32>
    %123 = tpu.matmul %117, %2, %cst_49 {dimension_numbers = #tpu.dot_dimension_numbers<[1], [0], [0], [1], [0, 0, 1, 1], [], []>} : vector<2x16xf32>, vector<16x8xf32>, vector<2x8xf32> -> vector<2x8xf32>
    %c0_50 = arith.constant 0 : index
    %c32_51 = arith.constant 32 : index
    %124 = vector.load %arg6[%c0_50, %c32_51] : memref<2x128xf32, #tpu.memory_space<vmem>>, vector<2x8xf32>
    tpu.vector_store %arg6[%c0_50, %c32_51], %123 {strides = array<i32>} : memref<2x128xf32, #tpu.memory_space<vmem>>, vector<2x8xf32>,
    %125 = vector.extract_strided_slice %95 {offsets = [0, 32], sizes = [2, 32], strides = [1, 1]} : vector<2x64xbf16> to vector<2x32xbf16>
    %126 = vector.extract_strided_slice %96 {offsets = [0, 64], sizes = [16, 32], strides = [1, 1]} : vector<16x128xbf16> to vector<16x32xbf16>
    %127 = vector.extract_strided_slice %96 {offsets = [0, 96], sizes = [16, 32], strides = [1, 1]} : vector<16x128xbf16> to vector<16x32xbf16>
    %cst_52 = arith.constant dense<0.000000e+00> : vector<2x16xf32>
    %128 = tpu.matmul %125, %126, %cst_52 {dimension_numbers = #tpu.dot_dimension_numbers<[1], [1], [0], [0], [0, 0, 1, 0], [], []>} : vector<2x32xbf16>, vector<16x32xbf16>, vector<2x16xf32> -> vector<2x16xf32>
    %cst_53 = arith.constant 0.176776692 : f32
    %129 = vector.broadcast %cst_53 : f32 to vector<2x16xf32>
    %130 = arith.mulf %128, %129 : vector<2x16xf32>
    %cst_54 = arith.constant -1.000000e+09 : f32
    %131 = vector.broadcast %cst_54 : f32 to vector<2x16xf32>
    %132 = arith.select %94, %130, %131 : vector<2x16xi1>, vector<2x16xf32>
    %133 = arith.addf %132, %4 : vector<2x16xf32>
    %cst_55 = arith.constant dense<0xFF800000> : vector<2xf32>
    %134 = vector.multi_reduction <maximumf>, %133, %cst_55 [1] : vector<2x16xf32> to vector<2xf32>
    %135 = vector.shape_cast %134 : vector<2xf32> to vector<2x1xf32>
    %136 = vector.broadcast %135 : vector<2x1xf32> to vector<2x16xf32>
    %137 = arith.subf %133, %136 : vector<2x16xf32>
    %138 = math.exp %137 : vector<2x16xf32>
    %cst_56 = arith.constant dense<0.000000e+00> : vector<2xf32>
    %139 = vector.multi_reduction <add>, %138, %cst_56 [1] : vector<2x16xf32> to vector<2xf32>
    %140 = vector.shape_cast %139 : vector<2xf32> to vector<2x1xf32>
    %141 = tpu.reciprocal %140 {approx = true} : vector<2x1xf32> -> vector<2x1xf32>
    %142 = vector.broadcast %141 : vector<2x1xf32> to vector<2x16xf32>
    %143 = arith.mulf %138, %142 : vector<2x16xf32>
    %144 = arith.truncf %143 : vector<2x16xf32> to vector<2x16xbf16>
    %cst_57 = arith.constant dense<0.000000e+00> : vector<2x32xf32>
    %145 = tpu.matmul %144, %127, %cst_57 {dimension_numbers = #tpu.dot_dimension_numbers<[1], [0], [0], [1], [0, 0, 1, 1], [], []>} : vector<2x16xbf16>, vector<16x32xbf16>, vector<2x32xf32> -> vector<2x32xf32>
    %c288 = arith.constant 288 : index
    %c0_58 = arith.constant 0 : index
    %146 = vector.load %arg3[%c288, %c0_58] : memref<320x128xbf16, #tpu.memory_space<vmem>>, vector<32x32xbf16>
    %147 = arith.truncf %145 : vector<2x32xf32> to vector<2x32xbf16>
    %cst_59 = arith.constant dense<0.000000e+00> : vector<2x32xf32>
    %148 = tpu.matmul %147, %146, %cst_59 {dimension_numbers = #tpu.dot_dimension_numbers<[1], [0], [0], [1], [0, 0, 1, 1], [], []>} : vector<2x32xbf16>, vector<32x32xbf16>, vector<2x32xf32> -> vector<2x32xf32>
    %149 = arith.addf %122, %148 : vector<2x32xf32>
    %cst_60 = arith.constant dense<0.000000e+00> : vector<2x8xf32>
    %150 = tpu.matmul %143, %2, %cst_60 {dimension_numbers = #tpu.dot_dimension_numbers<[1], [0], [0], [1], [0, 0, 1, 1], [], []>} : vector<2x16xf32>, vector<16x8xf32>, vector<2x8xf32> -> vector<2x8xf32>
    %c0_61 = arith.constant 0 : index
    %c40 = arith.constant 40 : index
    %151 = vector.load %arg6[%c0_61, %c40] : memref<2x128xf32, #tpu.memory_space<vmem>>, vector<2x8xf32>
    tpu.vector_store %arg6[%c0_61, %c40], %150 {strides = array<i32>} : memref<2x128xf32, #tpu.memory_space<vmem>>, vector<2x8xf32>,
    %152 = vector.broadcast %11 : vector<1x32xf32> to vector<2x32xf32>
    %153 = arith.addf %149, %152 : vector<2x32xf32>
    %c0_62 = arith.constant 0 : index
    %c0_63 = arith.constant 0 : index
    %154 = vector.load %arg6[%c0_62, %c0_63] : memref<2x128xf32, #tpu.memory_space<vmem>>, vector<2x32xf32>
    tpu.vector_store %arg6[%c0_62, %c0_63], %153 {strides = array<i32>} : memref<2x128xf32, #tpu.memory_space<vmem>>, vector<2x32xf32>,
    return
  }
}

</mosaic_0001>

<bundles_post_ra>
// kernel: robot_human_attention.1
= control target key start
LH: loop header
LB: loop body
LE: loop exit
PB: predicated region body
PF: predicated region fallthrough
CT: control target
= control target key end

     0   :  { %11 = vsyncpa [#allocation3], 0  ;;  %s2749_s0 = inlined_call_operand.vmem [shape: bf16[2,32], index: 0, kind: input, shape index: {}]   ;;  %s2750_s1 = inlined_call_operand.vmem [shape: bf16[16,32], index: 1, kind: input, shape index: {}]   ;;  %s2751_s2 = inlined_call_operand.vmem [shape: f32[2,1], index: 2, kind: input, shape index: {}]   ;;  %s2752_s3 = inlined_call_operand.hbm [shape: bf16[320,128], index: 3, kind: input, shape index: {}]   ;;  %s2753_s4 = inlined_call_operand.vmem [shape: f32[24,128], index: 4, kind: input, shape index: {}]   ;;  %s2754_s5 = inlined_call_operand.hbm [shape: f32[224,128], index: 5, kind: input, shape index: {}]   ;;  %s2755_s6 = inlined_call_operand.vmem [shape: f32[2,128], index: 6, kind: output, shape index: {}]  }
   0x1   :  { %12 = vsyncpa [#allocation5], 0  ;;  %s2384_s21 = smov [#allocation2]   ;;  %s2336_s25 = scalar_lea.hbm %s2752_s3, 2560 }
   0x2   :  { %s24_s22 = sshll.u32 %s2384_s21, 4  ;;  %p2337_p0 = scmp.ne.s32.totalorder %s2752_s3, %s2336_s25  ;;  %s25_s22 = int_to_ptr.vmem [resolvable:$true] %s24_s22 }
   0x3   :  { %p2340_p1 = scmp.lt.u32.totalorder %s2336_s25, %s2752_s3 }
   0x5   :  { %p2342_p2 = pnand %p2340_p1, %p2337_p0 }
   0x7   :  { %2345 = shalt.err (!%p2342_p2)
}
   0x8   :  { %s2346_s30 = scalar_lea.vmem %s25_s22, 2560  ;;  %p2351_p4 = scmp.lt.s32.totalorder %s25_s22, %s25_s22 }
   0x9   :  { %p2347_p3 = scmp.ne.s32.totalorder %s25_s22, %s2346_s30  ;;  %p2352_p5 = scmp.lt.s32.totalorder %s2346_s30, %s2346_s30 }
   0xb   :  { %p2353_p6 = por %p2352_p5, %p2351_p4 }
   0xd   :  { %p2354_p7 = pnand %p2353_p6, %p2347_p3 }
   0xf   :  { %2357 = shalt.err (!%p2354_p7)
}
  0x10   :  { %s2385_s7 = smov 64   ;;  %s2386_s8 = smov 4  }
  0x11   :  { %30 = dma.hbm_to_vmem [thread:$0]  %s2752_s3, 2560, %s25_s22, [#allocation3], %s2385_s7, %s2385_s7, %s2386_s8  }
  0x12   :  { %s2387_s11 = smov [#allocation4]   ;;  %s2358_s15 = scalar_lea.hbm %s2754_s5, 3584 }
  0x13   :  { %s38_s12 = sshll.u32 %s2387_s11, 4  ;;  %p2359_p8 = scmp.ne.s32.totalorder %s2754_s5, %s2358_s15  ;;  %s39_s12 = int_to_ptr.vmem [resolvable:$true] %s38_s12 }
  0x14   :  { %p2362_p9 = scmp.lt.u32.totalorder %s2358_s15, %s2754_s5 }
  0x16   :  { %p2364_p10 = pnand %p2362_p9, %p2359_p8 }
  0x18   :  { %2367 = shalt.err (!%p2364_p10)
}
  0x19   :  { %s2368_s20 = scalar_lea.vmem %s39_s12, 3584  ;;  %p2373_p12 = scmp.lt.s32.totalorder %s39_s12, %s39_s12 }
  0x1a   :  { %p2369_p11 = scmp.ne.s32.totalorder %s39_s12, %s2368_s20  ;;  %p2374_p13 = scmp.lt.s32.totalorder %s2368_s20, %s2368_s20 }
  0x1c   :  { %p2375_p0 = por %p2374_p13, %p2373_p12 }
  0x1e   :  { %p2376_p1 = pnand %p2375_p0, %p2369_p11 }
  0x20   :  { %2379 = shalt.err (!%p2376_p1)
}
  0x21   :  { %s2388_s3 = smov 128   ;;  %s2389_s21 = smov 8  }
  0x22   :  { %44 = dma.hbm_to_vmem [thread:$0]  %s2754_s5, 3584, %s39_s12, [#allocation5], %s2388_s3, %s2388_s3, %s2389_s21  }
  0x23   :  { %2380 = dma.done.wait [#allocation3], 2560  }
  0x24   :  { %2381 = vsyncadd [#allocation3], 4294964736 }
  0x25   :  { %2382 = dma.done.wait [#allocation5], 3584  }
  0x26   :  { %2383 = vsyncadd [#allocation5], 4294963712  ;;  %v2390_v0 = vmov 0.0   ;;  %vm2391_vm0 = vmmov 0   ;;  %v2392_v1 = vmov 0.0|0.0   ;;  %v2295_v2 = vld [vmem:[#allocation2] sm:$0xff]   ;;  %v116_v17 = vlaneseq }
  0x27   :  { %1781 = vmatprep.subr.bf16.mxu0 %v2390_v0  ;;  %1082 = vst [vmem:[%s2755_s6] sm:$0x3] %v2390_v0  ;;  %1785 = vmatprep.mubr.msk.bf16.mxu0 %vm2391_vm0, %v2390_v0  ;;  %v2296_v3 = vld [vmem:[#allocation2 + $0x8] sm:$0xff]   ;;  %v68_v4 = vld [vmem:[#allocation4 + $0x80] sm:$0xff]  ;;  %v70_v7 = vld [vmem:[#allocation4 + $0x90] sm:$0xff]  ;;  %vm132_vm1 = vcmask 261120   ;;  %vm176_vm2 = vcmask 523264  }
  0x28   :  { %2099 = vmatprep.subr.bf16.mxu1 %v2392_v1  ;;  %1805 = vmatprep.mubr.msk.f32.mxu1 %vm2391_vm0, %v2390_v0  ;;  %v69_v5 = vld [vmem:[#allocation4 + $0x88] sm:$0xff]  ;;  %v71_v8 = vld [vmem:[#allocation4 + $0x98] sm:$0xff]  ;;  %v115_v9 = vld [vmem:[%s2749_s0] sm:$0x1]  ;;  %v2500_v18 = vshrl.u32 %v116_v17, 7  ;;  %vm1132_vm4 = vcmask 123904  }
  0x29   :  { %1782 = vmatpush3.bf16.msra.mxu0 %v2295_v2  ;;  %v2469_v6 = vpack.c.bf16 %v69_v5, %v68_v4  ;;  %v72_v10 = vld [vmem:[#allocation4 + $0xa0] sm:$0xff]  ;;  %v73_v11 = vld [vmem:[#allocation4 + $0xa8] sm:$0xff]  ;;  %v2475_v12 = vpack.c.bf16 %v71_v8, %v70_v7  ;;  %v74_v14 = vld [vmem:[#allocation4 + $0xb0] sm:$0xff]  ;;  %vm1149_vm5 = vcmask 130048   ;;  %vm1275_vm6 = vcmask 320768   ;;  %s2396_s12 = smov 40  }
  0x2a   :  { %1783 = vmatprep.subr.bf16.mxu0 %v2390_v0  ;;  %v2481_v13 = vpack.c.bf16 %v73_v11, %v72_v10  ;;  %v75_v15 = vld [vmem:[#allocation4 + $0xb8] sm:$0xff]  ;;  %v118_v19 = vsub.s32 0, %v2500_v18  ;;  %v2506_v20 = vld [vmem:[%s2753_s4] sm:$0x3f]  ;;  %v2297_v31 = vld [vmem:[#allocation2 + $0x10] sm:$0xff]   ;;  %v329_v38 = vsub.s32 1, %v2500_v18 }
  0x2b   :  { %2101 = vmatpush3.bf16.msra.mxu1 %v2469_v6  ;;  %v2494_v16 = vpack.c.bf16 %v75_v15, %v74_v14  ;;  %v2298_v32 = vld [vmem:[#allocation2 + $0x18] sm:$0xff]   ;;  %v2299_v33 = vld [vmem:[#allocation2 + $0x20] sm:$0xff]   ;;  %v2300_v34 = vld [vmem:[#allocation2 + $0x28] sm:$0xff]   ;;  %v334_v39 = vsub.s32 2, %v2500_v18  ;;  %v341_v51 = vsub.s32 3, %v2500_v18  ;;  %vm1581_vm7 = vcmask 386368  }
  0x2c   :  { %2102 = vmatprep.subr.bf16.mxu1 %v2392_v1  ;;  %v119_v21 = vrot.slane %v2506_v20, %v118_v19  ;;  %v330_v40 = vrot.slane %v2506_v20, %v329_v38  ;;  %v52_v48 = vld [vmem:[#allocation4] sm:$0xff]  ;;  %v53_v49 = vld [vmem:[#allocation4 + $0x8] sm:$0xff]  ;;  %v2301_v54 = vld [vmem:[#allocation2 + $0x30] sm:$0xff]   ;;  %vm1588_vm8 = vcmask 254976  }
  0x2d   :  { %1784 = vmatpush3.bf16.msra.mxu0 %v2296_v3  ;;  %v335_v43 = vrot.slane %v2506_v20, %v334_v39  ;;  %v2547_v50 = vpack.c.bf16 %v53_v49, %v52_v48  ;;  %v342_v52 = vrot.slane %v2506_v20, %v341_v51  ;;  %v2302_v59 = vld [vmem:[#allocation2 + $0x38] sm:$0xff]   ;;  %v54_v60 = vld [vmem:[#allocation4 + $0x10] sm:$0xff]  ;;  %v2303_v62 = vld [vmem:[%s2750_s1] sm:$0xff]  }
  0x2e   :  { %2111 = vmatprep.subr.bf16.mxu0 %v2392_v1  ;;  %v55_v61 = vld [vmem:[#allocation4 + $0x18] sm:$0xff]  ;;  %v56_v2 = vld [vmem:[#allocation4 + $0x20] sm:$0xff]  ;;  %v57_v3 = vld [vmem:[#allocation4 + $0x28] sm:$0xff] }
  0x2f   :  { %2104 = vmatpush3.bf16.msra.mxu1 %v2475_v12  ;;  %v2562_v63 = vpack.c.bf16 %v55_v61, %v54_v60  ;;  %v2567_v4 = vpack.c.bf16 %v57_v3, %v56_v2  ;;  %v58_v5 = vld [vmem:[#allocation4 + $0x30] sm:$0xff]  ;;  %v60_v8 = vld [vmem:[#allocation4 + $0x40] sm:$0xff]  ;;  %v65_v15 = vld [vmem:[#allocation4 + $0x68] sm:$0xff] }
  0x30   :  { %1786 = vmatmul.mubr.msk.bf16.vlgmr.msra.gmra.mrb[0].mxu0 %vm132_vm1, %v115_v9  ;;  %2105 = vmatprep.subr.bf16.mxu1 %v2392_v1  ;;  %v61_v9 = vld [vmem:[#allocation4 + $0x48] sm:$0xff]  ;;  %v62_v11 = vld [vmem:[#allocation4 + $0x50] sm:$0xff]  ;;  %v64_v14 = vld [vmem:[#allocation4 + $0x60] sm:$0xff] }
  0x31   :  { %2113 = vmatpush3.bf16.msra.mxu0 %v2469_v6  ;;  %1824 = vmatprep.mubr.msk.f32.mxu0 %vm2391_vm0, %v2390_v0  ;;  %v2575_v10 = vpack.c.bf16 %v61_v9, %v60_v8  ;;  %v66_v17 = vld [vmem:[#allocation4 + $0x70] sm:$0xff]  ;;  %v2308_v48 = vld [vmem:[#allocation2 + $0x60] sm:$0xff]   ;;  %v2309_v49 = vld [vmem:[#allocation2 + $0x68] sm:$0xff]  }
  0x32   :  { %2114 = vmatprep.subr.bf16.mxu0 %v2392_v1 }
  0x33   :  { %2107 = vmatpush3.bf16.msra.mxu1 %v2481_v13 }
  0x34   :  { %2108 = vmatprep.subr.bf16.mxu1 %v2392_v1 }
  0x35   :  { %2116 = vmatpush3.bf16.msra.mxu0 %v2475_v12 }
  0x36   :  { %2117 = vmatprep.subr.bf16.mxu0 %v2392_v1 }
  0x37   :  { %2110 = vmatpush3.bf16.msra.mxu1 %v2494_v16 }
  0x38   :  { %1827 = vmatprep.subr.bf16.mxu1 %v2390_v0 }
  0x39   :  { %2119 = vmatpush3.bf16.msra.mxu0 %v2481_v13 }
  0x3a   :  { %2120 = vmatprep.subr.bf16.mxu0 %v2392_v1 }
  0x3d   :  { %2122 = vmatpush3.bf16.msra.mxu0 %v2494_v16 }
  0x3e   :  { %2123 = vmatprep.subr.bf16.mxu0 %v2392_v1 }
 0x103   :  { %v170_v22 = vpop.f32.mrb[0].mxu0 }
 0x104   :  { %v171_v23 = vadd.f32 %v170_v22, %v119_v21  ;;  %v1787_v24 = vpop.f32.mrb[1].mxu0  ;;  %v67_v21 = vld [vmem:[#allocation4 + $0x78] sm:$0xff] }
 0x105   :  { %v173_v25 = vpop.f32.mrb[2].mxu0  ;;  %v2588_v22 = vpack.c.bf16 %v67_v21, %v66_v17 }
 0x106   :  { %v1788_v26 = vpop.f32.mrb[3].mxu0  ;;  %1806 = vmatmul.mubr.msk.f32.vlgmr.msra.gmra.mrb[0].mxu1 %vm176_vm2, %v171_v23 }
 0x107   :  { %1835 = vmatprep.mubr.msk.bf16.mxu1 %vm2391_vm0, %v2390_v0  ;;  %1828 = vmatpush3.bf16.msra.mxu1 %v2297_v31  ;;  %v2598_v26 = vld [vmem:[%s2753_s4 + $0x8] sm:$0x3f] }
 0x108   :  { %1829 = vmatprep.subr.bf16.mxu1 %v2390_v0 }
 0x10b   :  { %1830 = vmatpush3.bf16.msra.mxu1 %v2298_v32 }
 0x10c   :  { %1831 = vmatprep.subr.bf16.mxu1 %v2390_v0 }
 0x10f   :  { %1832 = vmatpush3.bf16.msra.mxu1 %v2299_v33 }
 0x110   :  { %1833 = vmatprep.subr.bf16.mxu1 %v2390_v0 }
 0x113   :  { %1834 = vmatpush3.bf16.msra.mxu1 %v2300_v34 }
 0x114   :  { %2135 = vmatprep.subr.bf16.mxu1 %v2392_v1 }
 0x1d9   :  { %v246_v27 = vpop.f32.mrb[0].mxu1 }
 0x1da   :  { %v250_v28 = vsub.f32 %v171_v23, %v246_v27  ;;  %v1807_v29 = vpop.f32.mrb[1].mxu1 }
 0x1dc   :  { %v251_v30 = vmul.f32 %v250_v28, %v250_v28 }
 0x1de   :  { %1825 = vmatmul.mubr.msk.f32.vlgmr.msra.gmra.mrb[4].mxu0 %vm176_vm2, %v251_v30 }
 0x1df   :  { %2125 = vmatpush3.bf16.msra.mxu0 %v2469_v6  ;;  %1855 = vmatprep.mubr.msk.f32.mxu0 %vm2391_vm0, %v2390_v0 }
 0x1e0   :  { %2126 = vmatprep.subr.bf16.mxu0 %v2392_v1 }
 0x1e3   :  { %2128 = vmatpush3.bf16.msra.mxu0 %v2475_v12 }
 0x1e4   :  { %2129 = vmatprep.subr.bf16.mxu0 %v2392_v1 }
 0x1e7   :  { %2131 = vmatpush3.bf16.msra.mxu0 %v2481_v13 }
 0x1e8   :  { %2132 = vmatprep.subr.bf16.mxu0 %v2392_v1 }
 0x1eb   :  { %2134 = vmatpush3.bf16.msra.mxu0 %v2494_v16 }
 0x1ec   :  { %1877 = vmatprep.subr.bf16.mxu0 %v2390_v0 }
 0x2b1   :  { %v321_v35 = vpop.f32.mrb[4].mxu0 }
 0x2b2   :  { %v322_v36 = vadd.f32 1e-05, %v321_v35  ;;  %v1826_v37 = vpop.f32.mrb[5].mxu0  ;;  %v2305_v35 = vld [vmem:[#allocation2 + $0x48] sm:$0xff]  }
 0x2b4   :  { %2316 = vrsqrt.f32 %v322_v36 }
 0x2be   :  { %v2317_v41 = vpop.eup %2316 }
 0x2bf   :  { %v326_v42 = vmul.f32 %v2317_v41, %v250_v28  ;;  %v575_v28 = vrot.slane %v2598_v26, %v118_v19  ;;  %v2304_v19 = vld [vmem:[#allocation2 + $0x40] sm:$0xff]  }
 0x2c1   :  { %v331_v44 = vmul.f32 %v330_v40, %v326_v42 }
 0x2c3   :  { %v336_v45 = vadd.f32 %v335_v43, %v331_v44 }
 0x2c5   :  { %v337_v46 = vmax.f32 %v336_v45, 0.0 }
 0x2c7   :  { %v338_v47 = vpack.c.bf16 %v337_v46, %v337_v46  ;;  %v2306_v46 = vld [vmem:[#allocation2 + $0x50] sm:$0xff]  }
 0x2c9   :  { %1836 = vmatmul.mubr.msk.bf16.vlgmr.msra.gmra.mrb[4].mxu1 %vm176_vm2, %v338_v47  ;;  %v2307_v47 = vld [vmem:[#allocation2 + $0x58] sm:$0xff]  }
 0x2ca   :  { %2137 = vmatpush3.bf16.msra.mxu1 %v2469_v6  ;;  %1874 = vmatprep.mubr.msk.f32.mxu1 %vm2391_vm0, %v2390_v0  ;;  %v59_v6 = vld [vmem:[#allocation4 + $0x38] sm:$0xff] }
 0x2cb   :  { %2138 = vmatprep.subr.bf16.mxu1 %v2392_v1  ;;  %v2571_v7 = vpack.c.bf16 %v59_v6, %v58_v5 }
 0x2ce   :  { %2140 = vmatpush3.bf16.msra.mxu1 %v2475_v12  ;;  %v63_v12 = vld [vmem:[#allocation4 + $0x58] sm:$0xff] }
 0x2cf   :  { %2141 = vmatprep.subr.bf16.mxu1 %v2392_v1 }
 0x2d2   :  { %2143 = vmatpush3.bf16.msra.mxu1 %v2481_v13  ;;  %v2580_v13 = vpack.c.bf16 %v63_v12, %v62_v11 }
 0x2d3   :  { %2144 = vmatprep.subr.bf16.mxu1 %v2392_v1 }
 0x2d6   :  { %2146 = vmatpush3.bf16.msra.mxu1 %v2494_v16  ;;  %v2584_v16 = vpack.c.bf16 %v65_v15, %v64_v14 }
 0x2d7   :  { %2180 = vmatprep.subr.bf16.mxu1 %v2547_v50 }
 0x39c   :  { %v404_v53 = vpop.f32.mrb[4].mxu1 }
 0x39d   :  { %v405_v55 = vadd.f32 %v404_v53, %v342_v52  ;;  %v1837_v56 = vpop.f32.mrb[5].mxu1  ;;  %v2310_v52 = vld [vmem:[#allocation2 + $0x70] sm:$0xff]   ;;  %v2311_v53 = vld [vmem:[#allocation2 + $0x78] sm:$0xff]  }
 0x39e   :  { %v407_v57 = vpop.f32.mrb[6].mxu1 }
 0x39f   :  { %v1838_v58 = vpop.f32.mrb[7].mxu1  ;;  %1856 = vmatmul.mubr.msk.f32.vlgmr.msra.gmra.mrb[6].mxu0 %vm176_vm2, %v405_v55 }
 0x3a0   :  { %1878 = vmatpush3.bf16.msra.mxu0 %v2301_v54  ;;  %1881 = vmatprep.mubr.msk.bf16.mxu0 %vm2391_vm0, %v2390_v0  ;;  %v798_v58 = vrot.slane %v2598_v26, %v329_v38  ;;  %v813_v38 = vrot.slane %v2598_v26, %v341_v51  ;;  %v1073_v51 = vld [vmem:[%s2751_s2] sm:$0x3]  ;;  %s2394_s2 = smov 96  }
 0x3a1   :  { %1879 = vmatprep.subr.bf16.mxu0 %v2390_v0 }
 0x3a4   :  { %1880 = vmatpush3.bf16.msra.mxu0 %v2302_v59 }
 0x3a5   :  { %2148 = vmatprep.subr.bf16.mxu0 %v2547_v50 }
 0x3a7   :  { %1882 = vmatmul.mubr.msk.bf16.vlgmr.msra.gmra.mrb[8].mxu0 %vm132_vm1, %v2303_v62  ;;  %v804_v62 = vrot.slane %v2598_v26, %v334_v39 }
 0x3a8   :  { %2150 = vmatpush3.bf16.msra.mxu0 %v2547_v50 }
 0x3a9   :  { %2152 = vmatprep.subr.bf16.mxu0 %v2562_v63 }
 0x3ac   :  { %2154 = vmatpush3.bf16.msra.mxu0 %v2562_v63 }
 0x3ad   :  { %2156 = vmatprep.subr.bf16.mxu0 %v2567_v4 }
 0x3b0   :  { %2158 = vmatpush3.bf16.msra.mxu0 %v2567_v4 }
 0x3b1   :  { %2160 = vmatprep.subr.bf16.mxu0 %v2571_v7 }
 0x3b4   :  { %2162 = vmatpush3.bf16.msra.mxu0 %v2571_v7 }
 0x3b5   :  { %2164 = vmatprep.subr.bf16.mxu0 %v2575_v10 }
 0x3b8   :  { %2166 = vmatpush3.bf16.msra.mxu0 %v2575_v10 }
 0x3b9   :  { %2168 = vmatprep.subr.bf16.mxu0 %v2580_v13 }
 0x3bc   :  { %2170 = vmatpush3.bf16.msra.mxu0 %v2580_v13 }
 0x3bd   :  { %2172 = vmatprep.subr.bf16.mxu0 %v2584_v16 }
 0x3c0   :  { %2174 = vmatpush3.bf16.msra.mxu0 %v2584_v16 }
 0x3c1   :  { %2176 = vmatprep.subr.bf16.mxu0 %v2588_v22 }
 0x3c4   :  { %2178 = vmatpush3.bf16.msra.mxu0 %v2588_v22 }
 0x3c5   :  { %1955 = vmatprep.subr.bf16.mxu0 %v2390_v0 }
 0x472   :  { %v479_v23 = vpop.f32.mrb[6].mxu0 }
 0x473   :  { %v2593_v24 = vsub.f32 %v405_v55, %v479_v23  ;;  %v1857_v25 = vpop.f32.mrb[7].mxu0 }
 0x475   :  { %v484_v27 = vmul.f32 %v2593_v24, %v2593_v24 }
 0x477   :  { %1875 = vmatmul.mubr.msk.f32.vlgmr.msra.gmra.mrb[2].mxu1 %vm176_vm2, %v484_v27 }
 0x478   :  { %2182 = vmatpush3.bf16.msra.mxu1 %v2547_v50 }
 0x479   :  { %2184 = vmatprep.subr.bf16.mxu1 %v2562_v63 }
 0x47a   :  { %v630_v29 = vpop.f32.mrb[8].mxu0 }
 0x47b   :  { %v631_v30 = vadd.f32 %v630_v29, %v575_v28  ;;  %v1883_v31 = vpop.f32.mrb[9].mxu0 }
 0x47c   :  { %v633_v32 = vpop.f32.mrb[10].mxu0  ;;  %2186 = vmatpush3.bf16.msra.mxu1 %v2562_v63 }
 0x47d   :  { %v634_v33 = vadd.f32 %v633_v32, %v575_v28  ;;  %v1884_v34 = vpop.f32.mrb[11].mxu0  ;;  %1917 = vmatprep.mubr.f32.mxu0 %v631_v30  ;;  %2188 = vmatprep.subr.bf16.mxu1 %v2567_v4 }
 0x47f   :  { %1918 = vmatmul.mubr.f32.vlgmr.msra.gmra.mrb[12].mxu0 %v634_v33 }
 0x480   :  { %2190 = vmatpush3.bf16.msra.mxu1 %v2567_v4  ;;  %1971 = vmatprep.mubr.msk.bf16.mxu0 %vm2391_vm0, %v2390_v0 }
 0x481   :  { %2192 = vmatprep.subr.bf16.mxu1 %v2571_v7  ;;  %1956 = vmatpush3.bf16.msra.mxu0 %v2304_v19 }
 0x482   :  { %1957 = vmatprep.subr.bf16.mxu0 %v2390_v0 }
 0x484   :  { %2194 = vmatpush3.bf16.msra.mxu1 %v2571_v7 }
 0x485   :  { %2196 = vmatprep.subr.bf16.mxu1 %v2575_v10  ;;  %1958 = vmatpush3.bf16.msra.mxu0 %v2305_v35 }
 0x486   :  { %1959 = vmatprep.subr.bf16.mxu0 %v2390_v0 }
 0x488   :  { %2198 = vmatpush3.bf16.msra.mxu1 %v2575_v10 }
 0x489   :  { %2200 = vmatprep.subr.bf16.mxu1 %v2580_v13  ;;  %1960 = vmatpush3.bf16.msra.mxu0 %v2306_v46 }
 0x48a   :  { %1961 = vmatprep.subr.bf16.mxu0 %v2390_v0 }
 0x48c   :  { %2202 = vmatpush3.bf16.msra.mxu1 %v2580_v13 }
 0x48d   :  { %2204 = vmatprep.subr.bf16.mxu1 %v2584_v16  ;;  %1962 = vmatpush3.bf16.msra.mxu0 %v2307_v47 }
 0x48e   :  { %1963 = vmatprep.subr.bf16.mxu0 %v2390_v0 }
 0x490   :  { %2206 = vmatpush3.bf16.msra.mxu1 %v2584_v16 }
 0x491   :  { %2208 = vmatprep.subr.bf16.mxu1 %v2588_v22  ;;  %1964 = vmatpush3.bf16.msra.mxu0 %v2308_v48 }
 0x492   :  { %1965 = vmatprep.subr.bf16.mxu0 %v2390_v0 }
 0x494   :  { %2210 = vmatpush3.bf16.msra.mxu1 %v2588_v22 }
 0x495   :  { %2212 = vmatprep.subr.bf16.mxu1 %v2547_v50  ;;  %1966 = vmatpush3.bf16.msra.mxu0 %v2309_v49 }
 0x496   :  { %1967 = vmatprep.subr.bf16.mxu0 %v2390_v0 }
 0x499   :  { %1968 = vmatpush3.bf16.msra.mxu0 %v2310_v52  ;;  %v78_v52 = vld [vmem:[#allocation4 + $0xd0] sm:$0x3] }
 0x49a   :  { %1969 = vmatprep.subr.bf16.mxu0 %v2390_v0 }
 0x49d   :  { %1970 = vmatpush3.bf16.msra.mxu0 %v2311_v53 }
 0x49e   :  { %2244 = vmatprep.subr.bf16.mxu0 %v2547_v50 }
 0x54a   :  { %v2626_v36 = vpop.f32.mrb[2].mxu1 }
 0x54b   :  { %v1876_v37 = vpop.f32.mrb[3].mxu1  ;;  %v555_v23 = vadd.f32 1e-05, %v2626_v36 }
 0x552   :  { %v1919_v40 = vpop.f32.mrb[12].mxu0 }
 0x553   :  { %v713_v41 = vsub.f32 %v634_v33, %v1919_v40  ;;  %v703_v42 = vpop.f32.mrb[13].mxu0  ;;  %v567_v33 = vsub.s32 5, %v2500_v18 }
 0x554   :  { %v712_v43 = vsub.f32 %v631_v30, %v703_v42  ;;  %v562_v30 = vsub.s32 4, %v2500_v18 }
 0x555   :  { %v715_v45 = vmul.f32 %v713_v41, %v713_v41  ;;  %v1070_v37 = vrot.slane %v2598_v26, %v567_v33  ;;  %v568_v48 = vrot.slane %v2506_v20, %v567_v33 }
 0x556   :  { %v714_v44 = vmul.f32 %v712_v43, %v712_v43  ;;  %v1064_v32 = vrot.slane %v2598_v26, %v562_v30  ;;  %v563_v42 = vrot.slane %v2506_v20, %v562_v30  ;;  %v79_v20 = vld [vmem:[#allocation4 + $0xd8] sm:$0x3] }
 0x558   :  { %1952 = vmatprep.mubr.f32.mxu1 %v714_v44 }
 0x559   :  { %1953 = vmatmul.mubr.f32.vlgmr.msra.gmra.mrb[8].mxu1 %v715_v45 }
 0x55a   :  { %2214 = vmatpush3.bf16.msra.mxu1 %v2547_v50 }
 0x55b   :  { %2216 = vmatprep.subr.bf16.mxu1 %v2562_v63 }
 0x55e   :  { %2218 = vmatpush3.bf16.msra.mxu1 %v2562_v63 }
 0x55f   :  { %2220 = vmatprep.subr.bf16.mxu1 %v2567_v4 }
 0x562   :  { %2222 = vmatpush3.bf16.msra.mxu1 %v2567_v4 }
 0x563   :  { %2224 = vmatprep.subr.bf16.mxu1 %v2571_v7 }
 0x566   :  { %2226 = vmatpush3.bf16.msra.mxu1 %v2571_v7 }
 0x567   :  { %2228 = vmatprep.subr.bf16.mxu1 %v2575_v10 }
 0x56a   :  { %2230 = vmatpush3.bf16.msra.mxu1 %v2575_v10 }
 0x56b   :  { %2232 = vmatprep.subr.bf16.mxu1 %v2580_v13 }
 0x56e   :  { %2234 = vmatpush3.bf16.msra.mxu1 %v2580_v13 }
 0x56f   :  { %2236 = vmatprep.subr.bf16.mxu1 %v2584_v16 }
 0x572   :  { %2238 = vmatpush3.bf16.msra.mxu1 %v2584_v16 }
 0x573   :  { %2240 = vmatprep.subr.bf16.mxu1 %v2588_v22 }
 0x576   :  { %2242 = vmatpush3.bf16.msra.mxu1 %v2588_v22 }
 0x577   :  { %2045 = vmatprep.subr.bf16.mxu1 %v2390_v0 }
 0x62c   :  { %v1954_v54 = vpop.f32.mrb[8].mxu1 }
 0x62d   :  { %v788_v55 = vadd.f32 1e-05, %v1954_v54  ;;  %v782_v56 = vpop.f32.mrb[9].mxu1 }
 0x62e   :  { %v783_v57 = vadd.f32 1e-05, %v782_v56 }
 0x62f   :  { %2318 = vrsqrt.f32 %v788_v55 }
 0x630   :  { %2320 = vrsqrt.f32 %v783_v57 }
 0x631   :  { %2322 = vrsqrt.f32 %v555_v23 }
 0x639   :  { %v2319_v59 = vpop.eup %2318 }
 0x63a   :  { %v2321_v60 = vpop.eup %2320  ;;  %v794_v61 = vmul.f32 %v2319_v59, %v713_v41 }
 0x63b   :  { %v793_v2 = vmul.f32 %v2321_v60, %v712_v43  ;;  %v2323_v31 = vpop.eup %2322 }
 0x63c   :  { %v800_v3 = vmul.f32 %v798_v58, %v794_v61  ;;  %v559_v41 = vmul.f32 %v2323_v31, %v2593_v24 }
 0x63d   :  { %v799_v5 = vmul.f32 %v798_v58, %v793_v2 }
 0x63e   :  { %v806_v6 = vadd.f32 %v804_v62, %v800_v3  ;;  %v564_v46 = vmul.f32 %v563_v42, %v559_v41 }
 0x63f   :  { %v805_v8 = vadd.f32 %v804_v62, %v799_v5 }
 0x640   :  { %v808_v9 = vmax.f32 %v806_v6, 0.0  ;;  %v569_v49 = vadd.f32 %v568_v48, %v564_v46 }
 0x641   :  { %v807_v11 = vmax.f32 %v805_v8, 0.0 }
 0x642   :  { %v1080_v26 = vpack.c.bf16 %v569_v49, %v569_v49 }
 0x643   :  { %v809_v12 = vpack.c.bf16 %v808_v9, %v807_v11  ;;  %v76_v9 = vld [vmem:[#allocation4 + $0xc0] sm:$0xff]  ;;  %v77_v11 = vld [vmem:[#allocation4 + $0xc8] sm:$0xff] }
 0x645   :  { %1972 = vmatmul.mubr.bf16.vlgmr.msra.gmra.mrb[16].mxu0 %v809_v12 }
 0x646   :  { %2246 = vmatpush3.bf16.msra.mxu0 %v2547_v50 }
 0x647   :  { %2248 = vmatprep.subr.bf16.mxu0 %v2562_v63 }
 0x64a   :  { %2250 = vmatpush3.bf16.msra.mxu0 %v2562_v63 }
 0x64b   :  { %2252 = vmatprep.subr.bf16.mxu0 %v2567_v4 }
 0x64e   :  { %2254 = vmatpush3.bf16.msra.mxu0 %v2567_v4 }
 0x64f   :  { %2256 = vmatprep.subr.bf16.mxu0 %v2571_v7 }
 0x652   :  { %2258 = vmatpush3.bf16.msra.mxu0 %v2571_v7 }
 0x653   :  { %2260 = vmatprep.subr.bf16.mxu0 %v2575_v10 }
 0x656   :  { %2262 = vmatpush3.bf16.msra.mxu0 %v2575_v10 }
 0x657   :  { %2264 = vmatprep.subr.bf16.mxu0 %v2580_v13 }
 0x65a   :  { %2266 = vmatpush3.bf16.msra.mxu0 %v2580_v13 }
 0x65b   :  { %2268 = vmatprep.subr.bf16.mxu0 %v2584_v16 }
 0x65e   :  { %2270 = vmatpush3.bf16.msra.mxu0 %v2584_v16 }
 0x65f   :  { %2272 = vmatprep.subr.bf16.mxu0 %v2588_v22 }
 0x662   :  { %2274 = vmatpush3.bf16.msra.mxu0 %v2588_v22  ;;  %v2393_v22 = vmov 0  }
 0x663   :  { %2070 = vmatprep.subr.bf16.mxu0 %v2390_v0  ;;  %2294 = vset.pattern.permute.xlu0 %v2393_v22 }
 0x664   :  { %1076 = vperm.xlu0 %2294, %v1073_v51  }
 0x6e3   :  { %v1077_v24 = vpop.permute.xlu0 %1076 }
 0x6e4   :  { %vm1079_vm3 = vcmp.lt.f32.partialorder %v78_v52, %v1077_v24 }
 0x718   :  { %v896_v39 = vpop.f32.mrb[16].mxu0 }
 0x719   :  { %v897_v50 = vadd.f32 %v896_v39, %v813_v38  ;;  %v1973_v63 = vpop.f32.mrb[17].mxu0  ;;  %v2705_v39 = vpack.c.bf16 %v77_v11, %v76_v9 }
 0x71a   :  { %v899_v4 = vpop.f32.mrb[18].mxu0 }
 0x71b   :  { %v900_v7 = vadd.f32 %v899_v4, %v813_v38  ;;  %v1974_v10 = vpop.f32.mrb[19].mxu0  ;;  %2007 = vmatprep.mubr.f32.mxu1 %v897_v50 }
 0x71d   :  { %2008 = vmatmul.mubr.f32.vlgmr.msra.gmra.mrb[10].mxu1 %v900_v7 }
 0x71e   :  { %2047 = vmatprep.mubr.msk.bf16.mxu1 %vm2391_vm0, %v2390_v0 }
 0x7f0   :  { %v2009_v13 = vpop.f32.mrb[10].mxu1 }
 0x7f1   :  { %v979_v14 = vsub.f32 %v900_v7, %v2009_v13  ;;  %v969_v15 = vpop.f32.mrb[11].mxu1 }
 0x7f2   :  { %v978_v16 = vsub.f32 %v897_v50, %v969_v15 }
 0x7f3   :  { %v981_v21 = vmul.f32 %v979_v14, %v979_v14 }
 0x7f4   :  { %v980_v17 = vmul.f32 %v978_v16, %v978_v16 }
 0x7f6   :  { %2042 = vmatprep.mubr.f32.mxu0 %v980_v17 }
 0x7f7   :  { %2043 = vmatmul.mubr.f32.vlgmr.msra.gmra.mrb[14].mxu0 %v981_v21 }
 0x7f8   :  { %2072 = vmatprep.mubr.msk.bf16.mxu0 %vm2391_vm0, %v2390_v0 }
 0x8ca   :  { %v2044_v25 = vpop.f32.mrb[14].mxu0 }
 0x8cb   :  { %v1054_v27 = vadd.f32 1e-05, %v2044_v25  ;;  %v1048_v28 = vpop.f32.mrb[15].mxu0 }
 0x8cc   :  { %v1049_v29 = vadd.f32 1e-05, %v1048_v28 }
 0x8cd   :  { %2324 = vrsqrt.f32 %v1054_v27 }
 0x8ce   :  { %2326 = vrsqrt.f32 %v1049_v29 }
 0x8d7   :  { %v2325_v34 = vpop.eup %2324 }
 0x8d8   :  { %v2327_v19 = vpop.eup %2326  ;;  %v1060_v35 = vmul.f32 %v2325_v34, %v979_v14 }
 0x8d9   :  { %v1059_v36 = vmul.f32 %v2327_v19, %v978_v16  ;;  %v2314_v19 = vld [vmem:[#allocation2 + $0x90] sm:$0xff]  }
 0x8da   :  { %v1066_v40 = vmul.f32 %v1064_v32, %v1060_v35  ;;  %v2315_v35 = vld [vmem:[#allocation2 + $0x98] sm:$0xff]  }
 0x8db   :  { %v1065_v43 = vmul.f32 %v1064_v32, %v1059_v36 }
 0x8dc   :  { %v1072_v44 = vadd.f32 %v1070_v37, %v1066_v40 }
 0x8dd   :  { %v1071_v45 = vadd.f32 %v1070_v37, %v1065_v43  ;;  %v2312_v43 = vld [vmem:[#allocation2 + $0x80] sm:$0xff]  }
 0x8df   :  { %v2689_v47 = vpack.c.bf16 %v1072_v44, %v1071_v45 }
 0x8e1   :  { %v1087_v18 = vsel %vm132_vm1, %v2689_v47, 0 }
 0x8e2   :  { %2046 = vmatpush3.bf16.xpose.msra.mxu1 %v1087_v18 }
 0x8e3   :  { %2051 = vmatprep.subr.bf16.mxu1 %v2390_v0 }
 0x8e9   :  { %2048 = vmatmul.mubr.msk.bf16.vlgmr.msra.gmra.mrb[12].mxu1 %vm132_vm1, %v1080_v26 }
 0x8ea   :  { %2053 = vmatprep.mubr.msk.bf16.mxu1 %vm2391_vm0, %v2390_v0 }
 0x9bc   :  { %v1123_v53 = vpop.f32.mrb[12].mxu1 }
 0x9bd   :  { %v1129_v54 = vmul.f32 0.17677669, %v1123_v53  ;;  %v2049_v55 = vpop.f32.mrb[13].mxu1 }
 0x9be   :  { %v1126_v56 = vpop.f32.mrb[14].mxu1 }
 0x9bf   :  { %v1130_v57 = vsel %vm1079_vm3, %v1129_v54, -1e+09  ;;  %v2050_v58 = vpop.f32.mrb[15].mxu1 }
 0x9c0   :  { %v1131_v59 = vadd.f32 %v1130_v57, %v79_v20 }
 0x9c2   :  { %v1133_v60 = vsel %vm1132_vm4, %v1131_v59, -inf }
 0x9c3   :  { %1134 = vmax.xlane.f32.xlu0 %v1133_v60  ;;  %v1632_v60 = vld [vmem:[%s2753_s4 + $0x10] ss:$0 sm:$0xff] }
 0xa50   :  { %v1135_v61 = vpop.xlane.xlu0 %1134 }
 0xa51   :  { %v1136_v62 = vsub.f32 %v1131_v59, %v1135_v61 }
 0xa53   :  { %v1137_v2 = vmul.f32 1.442695, %v1136_v62 }
 0xa55   :  { %2328 = vpow2.f32 %v1137_v2 }
 0xa5f   :  { %v2329_v3 = vpop.eup %2328 }
 0xa60   :  { %v1139_v5 = vsel %vm1132_vm4, %v2329_v3, 0.0 }
 0xa61   :  { %1140 = vadd.xlane.f32.xlu1 %v1139_v5 }
 0xa72   :  { %1146 = vrot.lane.b32.xlu1 %v2689_v47, %s2394_s2 }
 0xa76   :  { %1280 = vrot.lane.b32.xlu1 %v2689_v47, %s2385_s7  ;;  %s2395_s7 = smov 32  }
 0xa7a   :  { %1278 = vrot.lane.b32.xlu1 %v1080_v26, %s2394_s2 }
 0xaee   :  { %v1141_v6 = vpop.xlane.xlu1 %1140 }
 0xaef   :  { %2330 = vrcp.f32 %v1141_v6 }
 0xaf2   :  { %v1147_v8 = vpop.permute.xlu1 %1146 }
 0xaf3   :  { %2052 = vmatpush3.bf16.msra.mxu1 %v1147_v8 }
 0xaf4   :  { %2275 = vmatprep.subr.bf16.mxu1 %v2392_v1 }
 0xaf6   :  { %v1281_v63 = vpop.permute.xlu1 %1280 }
 0xaf7   :  { %v1286_v4 = vsel %vm132_vm1, %v1281_v63, 0 }
 0xaf9   :  { %v2331_v12 = vpop.eup %2330 }
 0xafa   :  { %v1143_v38 = vmul.f32 %v2331_v12, %v2329_v3  ;;  %v1279_v7 = vpop.permute.xlu1 %1278 }
 0xafc   :  { %v1144_v50 = vpack.c.bf16 %v1143_v38, %v1143_v38 }
 0xafe   :  { %2054 = vmatmul.mubr.msk.bf16.vlgmr.msra.gmra.mrb[16].mxu1 %vm1149_vm5, %v1144_v50 }
 0xaff   :  { %2277 = vmatpush3.bf16.msra.mxu1 %v2705_v39  ;;  %2061 = vmatprep.mubr.msk.f32.mxu1 %vm2391_vm0, %v2390_v0 }
 0xb00   :  { %2064 = vmatprep.subr.bf16.mxu1 %v2390_v0 }
 0xb06   :  { %2062 = vmatmul.mubr.msk.f32.vlgmr.msra.gmra.mrb[20].mxu1 %vm1149_vm5, %v1143_v38 }
 0xb07   :  { %2066 = vmatprep.mubr.msk.bf16.mxu1 %vm2391_vm0, %v2390_v0 }
 0xb08   :  { %2065 = vmatpush3.bf16.xpose.msra.mxu1 %v1286_v4 }
 0xb09   :  { %2076 = vmatprep.subr.bf16.mxu1 %v2390_v0 }
 0xb0f   :  { %2067 = vmatmul.mubr.msk.bf16.vlgmr.msra.gmra.mrb[24].mxu1 %vm132_vm1, %v1279_v7 }
 0xb10   :  { %2080 = vmatprep.mubr.msk.bf16.mxu1 %vm2391_vm0, %v2390_v0  ;;  %2077 = vmatpush3.bf16.msra.mxu1 %v2314_v19 }
 0xb11   :  { %2078 = vmatprep.subr.bf16.mxu1 %v2390_v0 }
 0xb14   :  { %2079 = vmatpush3.bf16.msra.mxu1 %v2315_v35 }
 0xb15   :  { %2278 = vmatprep.subr.bf16.mxu1 %v2392_v1  ;;  %v2313_v1 = vld [vmem:[#allocation2 + $0x88] sm:$0xff]  }
 0xbd1   :  { %v1187_v10 = vpop.f32.mrb[16].mxu1 }
 0xbd2   :  { %v2055_v13 = vpop.f32.mrb[17].mxu1  ;;  %v1197_v45 = vpack.c.bf16 %v1187_v10, %v1187_v10 }
 0xbd3   :  { %v1190_v14 = vpop.f32.mrb[18].mxu1 }
 0xbd4   :  { %v2056_v15 = vpop.f32.mrb[19].mxu1 }
 0xbd9   :  { %v1267_v16 = vpop.f32.mrb[20].mxu1 }
 0xbda   :  { %v2063_v17 = vpop.f32.mrb[21].mxu1 }
 0xbe2   :  { %v1322_v21 = vpop.f32.mrb[24].mxu1 }
 0xbe3   :  { %v1328_v51 = vmul.f32 0.17677669, %v1322_v21  ;;  %v2068_v22 = vpop.f32.mrb[25].mxu1 }
 0xbe4   :  { %v1325_v23 = vpop.f32.mrb[26].mxu1 }
 0xbe5   :  { %v1329_v25 = vsel %vm1079_vm3, %v1328_v51, -1e+09  ;;  %v2069_v27 = vpop.f32.mrb[27].mxu1 }
 0xbe6   :  { %v1330_v28 = vadd.f32 %v1329_v25, %v79_v20 }
 0xbe8   :  { %v1331_v29 = vsel %vm1132_vm4, %v1330_v28, -inf }
 0xbe9   :  { %1332 = vmax.xlane.f32.xlu1 %v1331_v29 }
 0xc76   :  { %v1333_v30 = vpop.xlane.xlu1 %1332 }
 0xc77   :  { %v1334_v31 = vsub.f32 %v1330_v28, %v1333_v30 }
 0xc79   :  { %v1335_v32 = vmul.f32 1.442695, %v1334_v31 }
 0xc7b   :  { %2332 = vpow2.f32 %v1335_v32 }
 0xc85   :  { %v2333_v33 = vpop.eup %2332 }
 0xc86   :  { %v1337_v34 = vsel %vm1132_vm4, %v2333_v33, 0.0 }
 0xc87   :  { %1338 = vadd.xlane.f32.xlu0 %v1337_v34 }
 0xc9d   :  { %1343 = vrot.lane.b32.xlu0 %v2689_v47, %s2395_s7 }
 0xca1   :  { %1272 = vrot.lane.b32.xlu0 %v1267_v16, %s2395_s7 }
 0xd14   :  { %v1339_v37 = vpop.xlane.xlu0 %1338 }
 0xd15   :  { %2334 = vrcp.f32 %v1339_v37 }
 0xd18   :  { %v1344_v36 = vpop.permute.xlu0 %1343 }
 0xd19   :  { %2071 = vmatpush3.bf16.msra.mxu0 %v1344_v36 }
 0xd1a   :  { %2084 = vmatprep.subr.bf16.mxu0 %v2390_v0 }
 0xd1c   :  { %v1273_v40 = vpop.permute.xlu0 %1272 }
 0xd1d   :  { %1276 = vst.msk [vmem:[%s2755_s6] sm:$0x3] %vm1275_vm6, %v1273_v40 }
 0xd1f   :  { %v2335_v41 = vpop.eup %2334 }
 0xd20   :  { %v1341_v42 = vmul.f32 %v2335_v41, %v2333_v33 }
 0xd22   :  { %v1342_v44 = vpack.c.bf16 %v1341_v42, %v1341_v42 }
 0xd24   :  { %2073 = vmatmul.mubr.msk.bf16.vlgmr.msra.gmra.mrb[20].mxu0 %vm1149_vm5, %v1342_v44 }
 0xd25   :  { %2085 = vmatpush3.bf16.msra.mxu0 %v2312_v43  ;;  %2088 = vmatprep.mubr.msk.bf16.mxu0 %vm2391_vm0, %v2390_v0 }
 0xd26   :  { %2086 = vmatprep.subr.bf16.mxu0 %v2390_v0 }
 0xd29   :  { %2087 = vmatpush3.bf16.msra.mxu0 %v2313_v1 }
 0xd2c   :  { %2089 = vmatmul.mubr.msk.bf16.vlgmr.msra.gmra.mrb[24].mxu0 %vm132_vm1, %v1197_v45 }
 0xdf7   :  { %v1383_v46 = vpop.f32.mrb[20].mxu0 }
 0xdf8   :  { %v1393_v47 = vpack.c.bf16 %v1383_v46, %v1383_v46  ;;  %v2074_v48 = vpop.f32.mrb[21].mxu0 }
 0xdf9   :  { %v1386_v18 = vpop.f32.mrb[22].mxu0 }
 0xdfa   :  { %v2075_v49 = vpop.f32.mrb[23].mxu0  ;;  %2081 = vmatmul.mubr.msk.bf16.vlgmr.msra.gmra.mrb[28].mxu1 %vm132_vm1, %v1393_v47 }
 0xdfb   :  { %2280 = vmatpush3.bf16.msra.mxu1 %v2705_v39  ;;  %2096 = vmatprep.mubr.msk.f32.mxu1 %vm2391_vm0, %v2390_v0 }
 0xdff   :  { %v1498_v26 = vpop.f32.mrb[24].mxu0 }
 0xe00   :  { %v2090_v24 = vpop.f32.mrb[25].mxu0 }
 0xe01   :  { %v1501_v52 = vpop.f32.mrb[26].mxu0 }
 0xe02   :  { %v2091_v53 = vpop.f32.mrb[27].mxu0  ;;  %2097 = vmatmul.mubr.msk.f32.vlgmr.msra.gmra.mrb[22].mxu1 %vm1149_vm5, %v1341_v42 }
 0xecd   :  { %v1443_v54 = vpop.f32.mrb[28].mxu1 }
 0xece   :  { %v1499_v55 = vadd.f32 %v1498_v26, %v1443_v54  ;;  %v2082_v20 = vpop.f32.mrb[29].mxu1 }
 0xecf   :  { %v1446_v56 = vpop.f32.mrb[30].mxu1 }
 0xed0   :  { %v2083_v57 = vpop.f32.mrb[31].mxu1  ;;  %v1587_v0 = vadd.f32 %v1632_v60, %v1499_v55 }
 0xed5   :  { %v1573_v58 = vpop.f32.mrb[22].mxu1 }
 0xed6   :  { %1578 = vrot.lane.b32.xlu0 %v1573_v58, %s2396_s12  ;;  %v2098_v59 = vpop.f32.mrb[23].mxu1 }
 0xf48   :  { %v1579_v61 = vpop.permute.xlu0 %1578 }
 0xf49   :  { %1582 = vst.msk [vmem:[%s2755_s6] sm:$0x3] %vm1581_vm7, %v1579_v61 }
 0xf4a   :  { %1589 = vst.msk [vmem:[%s2755_s6] sm:$0x3] %vm1588_vm8, %v1587_v0 }
 0xf4b   :  { %1594 = vsyncpa [#allocation3], 1 }
 0xf4c   :  { %1595 = vsyncpa [#allocation5], 1 }

</bundles_post_ra>
